<compile_context>
chip_gen: v7x
topology: tpu7x:2x2x1
jax: 0.10.0
libtpu: 0.0.40
codegen_flags: <defaults>
</compile_context>

<pallas_src>
import math

import jax
import jax.numpy as jnp
import numpy as np
from jax.experimental import pallas as pl
from jax.experimental.pallas import tpu as pltpu


# --------------------------------- helpers -----------------------------------
def _round_up(a, m):
    return (a + m - 1) // m * m


def _log_sigmoid(x):
    # numerically stable logsigmoid, matches torch.nn.functional.logsigmoid
    return jnp.minimum(x, 0.0) - jnp.log1p(jnp.exp(-jnp.abs(x)))


def _parse_eos_type(eos_type, stick_breaking):
    if eos_type is None or eos_type == "trainable-softmax":
        assert not stick_breaking
        return "trainable-softmax", None
    if eos_type == "trainable-sigmoid":
        return "trainable-sigmoid", None
    assert isinstance(eos_type, float)
    assert not stick_breaking
    return "fixed", math.log(eos_type) - math.log(1.0 - eos_type)


def _vmem_limit(block_bytes):
    # Generation-aware VMEM budget: never ask for more than ~3/4 of the
    # per-core capacity (v7x: 64 MiB/TC; v5e/v6e: 128 MiB).
    cap = 64 << 20  # conservative default, valid on every generation
    try:
        cap = int(pltpu.get_tpu_info().vmem_capacity_bytes)
    except Exception:
        pass
    want = 4 * int(block_bytes) + (8 << 20)
    hi = max(cap * 3 // 4, 16 << 20)
    return int(min(max(want, 16 << 20), hi))


# --------------------------------- kernels -----------------------------------
def _linear_kernel(x_ref, w_ref, b_ref, o_ref):
    # 'trainable-softmax': plain linear; x cast to bf16 on the VPU in-kernel.
    acc = jnp.dot(x_ref[...].astype(jnp.bfloat16), w_ref[...],
                  preferred_element_type=jnp.float32)
    o_ref[...] = (acc + b_ref[...]).astype(o_ref.dtype)


def _make_sigmoid_onepass_kernel(v_real, fixed_eos_logit):
    """'trainable-sigmoid'/'fixed' when the whole vocab fits one lane tile."""

    def kernel(x_ref, w_ref, b_ref, o_ref):
        logits = jnp.dot(x_ref[...].astype(jnp.bfloat16), w_ref[...],
                         preferred_element_type=jnp.float32) + b_ref[...]
        tm, vp = logits.shape
        col = jax.lax.broadcasted_iota(jnp.int32, (tm, vp), 1)
        if fixed_eos_logit is None:
            eos = logits[:, 0:1]                       # static lane-0 slice
        else:
            eos = jnp.full((tm, 1), fixed_eos_logit, jnp.float32)
        # masked log-softmax over the real non-eos columns (1 .. v_real-1)
        valid_other = jnp.logical_and(col >= 1, col < v_real)
        masked = jnp.where(valid_other, logits, -jnp.inf)
        m = jnp.max(masked, axis=-1, keepdims=True)
        lse = m + jnp.log(jnp.sum(jnp.exp(masked - m), axis=-1, keepdims=True))
        out = jnp.where(col == 0, _log_sigmoid(eos),
                        _log_sigmoid(-eos) + (logits - lse))
        o_ref[...] = out.astype(o_ref.dtype)

    return kernel


def _make_sigmoid_twopass_kernel(v_real, fixed_eos_logit):
    """'trainable-sigmoid'/'fixed' with the vocab tiled on the grid.

    grid = (rows, phase, vocab_tiles).  Phase 0 sweeps the vocab tiles and
    accumulates the online max / sum-exp (and captures the eos logit);
    phase 1 recomputes each logits tile and writes the output.  Only an
    (H, tv) weight slab and a (tm, tv) logits tile are VMEM-resident.
    """

    def kernel(x_ref, w_ref, b_ref, o_ref, m_ref, l_ref, eos_ref):
        p = pl.program_id(1)
        j = pl.program_id(2)
        logits = jnp.dot(x_ref[...].astype(jnp.bfloat16), w_ref[...],
                         preferred_element_type=jnp.float32) + b_ref[...]
        tm, tv = logits.shape
        col = j * tv + jax.lax.broadcasted_iota(jnp.int32, (tm, tv), 1)
        valid_other = jnp.logical_and(col >= 1, col < v_real)

        @pl.when(p == 0)
        def _():
            @pl.when(j == 0)
            def _():
                m_ref[...] = jnp.full_like(m_ref, -jnp.inf)
                l_ref[...] = jnp.zeros_like(l_ref)
                if fixed_eos_logit is None:
                    eos_ref[...] = logits[:, 0:1]
                else:
                    eos_ref[...] = jnp.full_like(eos_ref, fixed_eos_logit)

            masked = jnp.where(valid_other, logits, -jnp.inf)
            m_new = jnp.maximum(m_ref[...],
                                jnp.max(masked, axis=-1, keepdims=True))
            l_ref[...] = (l_ref[...] * jnp.exp(m_ref[...] - m_new)
                          + jnp.sum(jnp.exp(masked - m_new), axis=-1,
                                    keepdims=True))
            m_ref[...] = m_new

        @pl.when(p == 1)
        def _():
            eos = eos_ref[...]
            lse = m_ref[...] + jnp.log(l_ref[...])
            out = jnp.where(col == 0, _log_sigmoid(eos),
                            _log_sigmoid(-eos) + (logits - lse))
            o_ref[...] = out.astype(o_ref.dtype)

    return kernel


def _make_stick_breaking_kernel(v_real):
    """'trainable-sigmoid' + stick_breaking, vocab tiled on the grid.

    The cumulative sum of log(1 - p) runs left-to-right, so a single sweep
    over vocab tiles with a per-row f32 carry suffices; inside a tile the
    inclusive cumsum is built from 128-wide chunks x a (128,128) f32
    upper-triangular matmul (O(V*128) FLOPs, no V x V buffer).
    """

    def kernel(x_ref, w_ref, b_ref, u_ref, o_ref, carry_ref):
        j = pl.program_id(1)

        @pl.when(j == 0)
        def _():
            carry_ref[...] = jnp.zeros_like(carry_ref)

        logits = jnp.dot(x_ref[...].astype(jnp.bfloat16), w_ref[...],
                         preferred_element_type=jnp.float32) + b_ref[...]
        tm, tv = logits.shape
        col = j * tv + jax.lax.broadcasted_iota(jnp.int32, (tm, tv), 1)

        # One EUP pass shared by logsigmoid(o) and logsigmoid(-o).
        t = jnp.log1p(jnp.exp(-jnp.abs(logits)))
        ls_pos = jnp.minimum(logits, 0.0) - t        # logsigmoid(o)
        ls_neg = jnp.minimum(-logits, 0.0) - t       # logsigmoid(-o)

        # log_probs:     [logsigmoid(o[:, :V-1]), 0, (pad zeros ...)]
        # log_probs_not: [0, logsigmoid(-o[:, 1:V]), (pad zeros ...)]
        log_p = jnp.where(col < v_real - 1, ls_pos, 0.0)
        log_p_not = jnp.where(jnp.logical_and(col >= 1, col < v_real),
                              ls_neg, 0.0)

        run = carry_ref[...]                         # (tm, 1) prefix so far
        u = u_ref[...]                               # (128,128) f32 upper-tri
        for b in range(tv // 128):
            lo, hi = b * 128, (b + 1) * 128
            incl = jnp.dot(log_p_not[:, lo:hi], u,
                           preferred_element_type=jnp.float32)
            o_ref[:, lo:hi] = (log_p[:, lo:hi] + run + incl).astype(o_ref.dtype)
            run = run + incl[:, 127:128]
        carry_ref[...] = run

    return kernel


# --------------------------------- wrapper -----------------------------------
def symbol_prediction_forward(x, weight, bias, *, eos_type=None,
                              stick_breaking=False, tm=256, tv=512,
                              out_dtype=None):
    """
    x:      (..., H) float
    weight: (V, H)   float  (torch Linear convention)
    bias:   (V,)     float
    returns (..., V) out_dtype (defaults to x.dtype)
    """
    mode, fixed_logit = _parse_eos_type(eos_type, stick_breaking)
    out_dtype = x.dtype if out_dtype is None else out_dtype
    out_isz = jnp.dtype(out_dtype).itemsize
    x_isz = jnp.dtype(x.dtype).itemsize

    lead = x.shape[:-1]
    h = int(x.shape[-1])
    v = int(weight.shape[0])
    n = int(np.prod(lead)) if lead else 1

    # ---- tiling --------------------------------------------------------
    tm_eff = min(int(tm), _round_up(n, 16))
    tm_eff = max(8, _round_up(tm_eff, 8))
    n_pad = _round_up(n, tm_eff)
    ni = n_pad // tm_eff

    tv_eff = max(128, _round_up(min(int(tv), _round_up(v, 128)), 128))
    v_pad = _round_up(v, tv_eff)            # multiple of tv_eff by design
    jv = v_pad // tv_eff

    # ---- operands (x stays f32; hidden dim never padded) ----------------
    x2 = x.reshape(n, h)
    if n_pad != n:
        x2 = jnp.pad(x2, ((0, n_pad - n), (0, 0)))
    w_t = weight.astype(jnp.bfloat16).T
    b2 = bias.astype(jnp.float32).reshape(1, v)
    if v_pad != v:
        w_t = jnp.pad(w_t, ((0, 0), (0, v_pad - v)))
        b2 = jnp.pad(b2, ((0, 0), (0, v_pad - v)))

    out_shape = jax.ShapeDtypeStruct((n_pad, v_pad), out_dtype)
    flops = 2 * n * h * v
    io_bytes = (n_pad * h * x_isz + h * v_pad * 2 + v_pad * 4
                + n_pad * v_pad * out_isz)

    if mode == "trainable-softmax":
        # ---- plain linear: 2-D grid, loop order picked so the bigger ----
        # ---- re-streamed operand is fetched from HBM exactly once -------
        blk = (tm_eff * h * x_isz + h * tv_eff * 2 + tv_eff * 4
               + tm_eff * tv_eff * out_isz)
        vocab_outer = ((ni - 1) * (h * v_pad * 2)
                       >= (jv - 1) * (n_pad * h * x_isz))
        if vocab_outer:
            grid = (jv, ni)
            x_map = lambda j, i: (i, 0)
            w_map = lambda j, i: (0, j)
            o_map = lambda j, i: (i, j)
        else:
            grid = (ni, jv)
            x_map = lambda i, j: (i, 0)
            w_map = lambda i, j: (0, j)
            o_map = lambda i, j: (i, j)
        out_flat = pl.pallas_call(
            _linear_kernel,
            out_shape=out_shape,
            grid_spec=pltpu.PrefetchScalarGridSpec(
                num_scalar_prefetch=0, grid=grid,
                in_specs=[pl.BlockSpec((tm_eff, h), x_map),
                          pl.BlockSpec((h, tv_eff), w_map),
                          pl.BlockSpec((1, tv_eff), w_map)],
                out_specs=pl.BlockSpec((tm_eff, tv_eff), o_map)),
            compiler_params=pltpu.CompilerParams(
                dimension_semantics=("parallel", "parallel"),
                vmem_limit_bytes=_vmem_limit(blk)),
            cost_estimate=pl.CostEstimate(flops=flops, transcendentals=0,
                                          bytes_accessed=io_bytes),
        )(x2, w_t, b2)

    elif stick_breaking:
        assert v >= 2, "eos handling needs at least 2 vocab entries"
        r = np.arange(128)
        u128 = jnp.asarray((r[:, None] <= r[None, :]).astype(np.float32))
        kernel = _make_stick_breaking_kernel(v)
        blk = (tm_eff * h * x_isz + h * tv_eff * 2 + tv_eff * 4
               + tm_eff * tv_eff * out_isz + 128 * 128 * 4 + tm_eff * 4)
        out_flat = pl.pallas_call(
            kernel,
            out_shape=out_shape,
            grid_spec=pltpu.PrefetchScalarGridSpec(
                num_scalar_prefetch=0, grid=(ni, jv),
                in_specs=[
                    pl.BlockSpec((tm_eff, h), lambda i, j: (i, 0)),
                    pl.BlockSpec((h, tv_eff), lambda i, j: (0, j)),
                    pl.BlockSpec((1, tv_eff), lambda i, j: (0, j)),
                    pl.BlockSpec((128, 128), lambda i, j: (0, 0)),
                ],
                out_specs=pl.BlockSpec((tm_eff, tv_eff), lambda i, j: (i, j)),
                scratch_shapes=[pltpu.VMEM((tm_eff, 1), jnp.float32)]),
            compiler_params=pltpu.CompilerParams(
                dimension_semantics=("parallel", "arbitrary"),
                vmem_limit_bytes=_vmem_limit(blk)),
            cost_estimate=pl.CostEstimate(
                flops=flops + 2 * n * v_pad * 128,
                transcendentals=2 * n * v,
                bytes_accessed=io_bytes + 128 * 128 * 4),
        )(x2, w_t, b2, u128)

    else:
        # ---- 'trainable-sigmoid' / fixed eos ---------------------------
        assert v >= 2, "eos handling needs at least 2 vocab entries"
        cost = pl.CostEstimate(flops=(flops if jv == 1 else 2 * flops),
                               transcendentals=3 * n * v,
                               bytes_accessed=io_bytes)
        if jv == 1:
            # whole vocab fits one lane tile -> cheaper single-pass kernel
            kernel = _make_sigmoid_onepass_kernel(v, fixed_logit)
            blk = (tm_eff * h * x_isz + h * v_pad * 2 + v_pad * 4
                   + tm_eff * v_pad * out_isz)
            out_flat = pl.pallas_call(
                kernel,
                out_shape=out_shape,
                grid_spec=pltpu.PrefetchScalarGridSpec(
                    num_scalar_prefetch=0, grid=(ni,),
                    in_specs=[
                        pl.BlockSpec((tm_eff, h), lambda i: (i, 0)),
                        pl.BlockSpec((h, v_pad), lambda i: (0, 0)),
                        pl.BlockSpec((1, v_pad), lambda i: (0, 0)),
                    ],
                    out_specs=pl.BlockSpec((tm_eff, v_pad), lambda i: (i, 0))),
                compiler_params=pltpu.CompilerParams(
                    dimension_semantics=("parallel",),
                    vmem_limit_bytes=_vmem_limit(blk)),
                cost_estimate=cost,
            )(x2, w_t, b2)
        else:
            # vocab-tiled two-pass (online max / sum-exp) kernel
            kernel = _make_sigmoid_twopass_kernel(v, fixed_logit)
            blk = (tm_eff * h * x_isz + h * tv_eff * 2 + tv_eff * 4
                   + tm_eff * tv_eff * out_isz + 3 * tm_eff * 4)
            out_flat = pl.pallas_call(
                kernel,
                out_shape=out_shape,
                grid_spec=pltpu.PrefetchScalarGridSpec(
                    num_scalar_prefetch=0, grid=(ni, 2, jv),
                    in_specs=[
                        pl.BlockSpec((tm_eff, h), lambda i, p, j: (i, 0)),
                        pl.BlockSpec((h, tv_eff), lambda i, p, j: (0, j)),
                        pl.BlockSpec((1, tv_eff), lambda i, p, j: (0, j)),
                    ],
                    # phase 0 parks the output window on block (i, 0) so no
                    # unwritten block is ever flushed; phase 1 writes (i, j).
                    out_specs=pl.BlockSpec((tm_eff, tv_eff),
                                           lambda i, p, j: (i, j * p)),
                    scratch_shapes=[pltpu.VMEM((tm_eff, 1), jnp.float32)] * 3),
                compiler_params=pltpu.CompilerParams(
                    dimension_semantics=("parallel", "arbitrary", "arbitrary"),
                    vmem_limit_bytes=_vmem_limit(blk)),
                cost_estimate=cost,
            )(x2, w_t, b2)

    out = out_flat[:n, :v]
    return out.reshape(*lead, v)


# ----------------------------- pure-JAX reference ----------------------------
def reference_forward(x, weight, bias, *, eos_type=None, stick_breaking=False):
    mode, fixed_logit = _parse_eos_type(eos_type, stick_breaking)
    out = x @ weight.T + bias
    if mode == "trainable-softmax":
        return out
    if mode == "trainable-sigmoid" and stick_breaking:
        shape = out.shape
        o = out.reshape(-1, shape[-1])
        zeros = jnp.zeros((o.shape[0], 1), o.dtype)
        log_p = jnp.concatenate([_log_sigmoid(o[:, :-1]), zeros], axis=1)
        log_p_not = jnp.concatenate([zeros, _log_sigmoid(-o[:, 1:])], axis=1)
        return (log_p + jnp.cumsum(log_p_not, axis=1)).reshape(shape)
    eos = out[..., :1]
    if mode == "fixed":
        eos = jnp.full_like(eos, fixed_logit)
    other = out[..., 1:]
    return jnp.concatenate(
        [_log_sigmoid(eos),
         _log_sigmoid(-eos) + jax.nn.log_softmax(other, axis=-1)],
        axis=-1)


if __name__ == "__main__":
    key = jax.random.PRNGKey(0)
    B, S, H = 2, 8, 32

    configs = [
        dict(eos_type=None, stick_breaking=False),                 # softmax
        dict(eos_type="trainable-sigmoid", stick_breaking=False),  # sigmoid eos
        dict(eos_type="trainable-sigmoid", stick_breaking=True),   # stick-break
        dict(eos_type=0.1, stick_breaking=False),                  # fixed eos
    ]

    # (V, tiling kwargs): the small V exercises the single-block paths, the
    # larger V with tiny tiles exercises the vocab-tiled / two-pass / carry
    # paths (multiple row tiles and multiple vocab tiles).
    cases = [(16, dict()), (300, dict(tm=8, tv=128))]

    k_x, k_w = jax.random.split(key)
    x = jax.random.normal(k_x, (B, S, H), dtype=jnp.float32)
    # The kernels feed the MXU bf16 operands (f32 accumulation); compare
    # against a reference built from the same bf16-rounded inputs so the check
    # isolates the kernel math from that precision policy.
    x_ref = x.astype(jnp.bfloat16).astype(jnp.float32)

    for V, tiling in cases:
        bound = 1.0 / math.sqrt(H)
        kw, kb = jax.random.split(jax.random.fold_in(k_w, V))
        weight = jax.random.uniform(kw, (V, H), jnp.float32, -bound, bound)
        bias = jax.random.uniform(kb, (V,), jnp.float32, -bound, bound)
        w_ref = weight.astype(jnp.bfloat16).astype(jnp.float32)

        for cfg in configs:
            out = symbol_prediction_forward(x, weight, bias, **cfg, **tiling)
            out = jax.block_until_ready(out)
            ref = reference_forward(x_ref, w_ref, bias, **cfg)
            assert out.shape == (B, S, V)
            np.testing.assert_allclose(np.asarray(out), np.asarray(ref),
                                       rtol=2e-2, atol=2e-2)

    print("KERNEL_OK")
</pallas_src>

<mosaic_0001>
module attributes {stable_mosaic.version = 11 : i64} {
  func.func @_linear_kernel(%arg0: i32, %arg1: i32, %arg2: memref<16x32xf32, #tpu.memory_space<vmem>>, %arg3: memref<32x128xbf16, #tpu.memory_space<vmem>>, %arg4: memref<1x128xf32, #tpu.memory_space<vmem>>, %arg5: memref<16x128xf32, #tpu.memory_space<vmem>>) attributes {dimension_semantics = [#tpu.dimension_semantics<parallel>, #tpu.dimension_semantics<parallel>], iteration_bounds = array<i64: 1, 1>, scalar_prefetch = 0 : i64, scratch_operands = 0 : i64, tpu.core_type = #tpu.core_type<tc>, window_params = [{transform_indices = @transform_0, window_bounds = array<i64: 16, 32>}, {transform_indices = @transform_1, window_bounds = array<i64: 32, 128>}, {transform_indices = @transform_2, window_bounds = array<i64: 1, 128>}, {transform_indices = @transform_3, window_bounds = array<i64: 16, 128>}]} {
    %c0 = arith.constant 0 : index
    %c0_0 = arith.constant 0 : index
    %0 = vector.load %arg2[%c0, %c0_0] : memref<16x32xf32, #tpu.memory_space<vmem>>, vector<16x32xf32>
    %1 = arith.truncf %0 : vector<16x32xf32> to vector<16x32xbf16>
    %c0_1 = arith.constant 0 : index
    %c0_2 = arith.constant 0 : index
    %2 = vector.load %arg3[%c0_1, %c0_2] : memref<32x128xbf16, #tpu.memory_space<vmem>>, vector<32x128xbf16>
    %cst = arith.constant dense<0.000000e+00> : vector<16x128xf32>
    %3 = tpu.matmul %1, %2, %cst {dimension_numbers = #tpu.dot_dimension_numbers<[1], [0], [0], [1], [0, 0, 1, 1], [], []>} : vector<16x32xbf16>, vector<32x128xbf16>, vector<16x128xf32> -> vector<16x128xf32>
    %c0_3 = arith.constant 0 : index
    %c0_4 = arith.constant 0 : index
    %4 = vector.load %arg4[%c0_3, %c0_4] : memref<1x128xf32, #tpu.memory_space<vmem>>, vector<1x128xf32>
    %5 = vector.broadcast %4 : vector<1x128xf32> to vector<16x128xf32>
    %6 = arith.addf %3, %5 : vector<16x128xf32>
    %c0_5 = arith.constant 0 : index
    %c0_6 = arith.constant 0 : index
    %7 = vector.load %arg5[%c0_5, %c0_6] : memref<16x128xf32, #tpu.memory_space<vmem>>, vector<16x128xf32>
    tpu.vector_store %arg5[%c0_5, %c0_6], %6 {strides = array<i32>} : memref<16x128xf32, #tpu.memory_space<vmem>>, vector<16x128xf32>,
    return
  }
  func.func @transform_0(%arg0: i32, %arg1: i32) -> (i32, i32) {
    %c0_i32 = arith.constant 0 : i32
    %c0_i32_0 = arith.constant 0 : i32
    return %arg1, %c0_i32 : i32, i32
  }
  func.func @transform_1(%arg0: i32, %arg1: i32) -> (i32, i32) {
    %c0_i32 = arith.constant 0 : i32
    %c0_i32_0 = arith.constant 0 : i32
    return %c0_i32, %arg0 : i32, i32
  }
  func.func @transform_2(%arg0: i32, %arg1: i32) -> (i32, i32) {
    %c0_i32 = arith.constant 0 : i32
    %c0_i32_0 = arith.constant 0 : i32
    return %c0_i32, %arg0 : i32, i32
  }
  func.func @transform_3(%arg0: i32, %arg1: i32) -> (i32, i32) {
    %c0_i32 = arith.constant 0 : i32
    return %arg1, %arg0 : i32, i32
  }
}

</mosaic_0001>

<bundles_post_ra>
// kernel: tpu_custom_call.1
= control target key start
LH: loop header
LB: loop body
LE: loop exit
PB: predicated region body
PF: predicated region fallthrough
CT: control target
= control target key end

     0   :  { %8 = vsyncpa [#allocation3], 0  ;;  %s307_s0 = inlined_call_operand.hbm [shape: f32[16,32], index: 0, kind: input, shape index: {}]   ;;  %s308_s1 = inlined_call_operand.hbm [shape: bf16[32,128], index: 1, kind: input, shape index: {}]   ;;  %s309_s2 = inlined_call_operand.vmem [shape: f32[1,128], index: 2, kind: input, shape index: {}]   ;;  %s310_s3 = inlined_call_operand.hbm [shape: f32[16,128], index: 3, kind: output, shape index: {}]  }
   0x1   :  { %9 = vsyncpa [#allocation6], 0 }
   0x2   :  { %10 = vsyncpa [#allocation4], 0  ;;  %s233_s12 = smov [#allocation2]   ;;  %s161_s16 = scalar_lea.hbm %s307_s0, 256 }
   0x3   :  { %s16_s13 = sshll.u32 %s233_s12, 4  ;;  %p162_p0 = scmp.ne.s32.totalorder %s307_s0, %s161_s16  ;;  %s17_s13 = int_to_ptr.vmem [resolvable:$true] %s16_s13 }
   0x4   :  { %p165_p1 = scmp.lt.u32.totalorder %s161_s16, %s307_s0 }
   0x6   :  { %p167_p2 = pnand %p165_p1, %p162_p0 }
   0x8   :  { %170 = shalt.err (!%p167_p2)
}
   0x9   :  { %s171_s21 = scalar_lea.vmem %s17_s13, 256  ;;  %p176_p4 = scmp.lt.s32.totalorder %s17_s13, %s17_s13 }
   0xa   :  { %p172_p3 = scmp.ne.s32.totalorder %s17_s13, %s171_s21  ;;  %p177_p5 = scmp.lt.s32.totalorder %s171_s21, %s171_s21 }
   0xc   :  { %p178_p6 = por %p177_p5, %p176_p4 }
   0xe   :  { %p179_p7 = pnand %p178_p6, %p172_p3 }
  0x10   :  { %182 = shalt.err (!%p179_p7)
}
  0x11   :  { %s234_s22 = smov 128   ;;  %s235_s23 = smov 8  }
  0x12   :  { %22 = dma.hbm_to_vmem [thread:$0]  %s307_s0, 256, %s17_s13, [#allocation3], %s234_s22, %s234_s22, %s235_s23  }
  0x13   :  { %s236_s26 = smov [#allocation5]   ;;  %s183_s30 = scalar_lea.hbm %s308_s1, 256 }
  0x14   :  { %s28_s27 = sshll.u32 %s236_s26, 4  ;;  %p184_p8 = scmp.ne.s32.totalorder %s308_s1, %s183_s30  ;;  %s29_s27 = int_to_ptr.vmem [resolvable:$true] %s28_s27 }
  0x15   :  { %p187_p9 = scmp.lt.u32.totalorder %s183_s30, %s308_s1 }
  0x17   :  { %p189_p10 = pnand %p187_p9, %p184_p8 }
  0x19   :  { %192 = shalt.err (!%p189_p10)
}
  0x1a   :  { %s193_s8 = scalar_lea.vmem %s29_s27, 256  ;;  %p198_p12 = scmp.lt.s32.totalorder %s29_s27, %s29_s27 }
  0x1b   :  { %p194_p11 = scmp.ne.s32.totalorder %s29_s27, %s193_s8  ;;  %p199_p13 = scmp.lt.s32.totalorder %s193_s8, %s193_s8 }
  0x1d   :  { %p200_p0 = por %p199_p13, %p198_p12 }
  0x1f   :  { %p201_p1 = pnand %p200_p0, %p194_p11 }
  0x21   :  { %204 = shalt.err (!%p201_p1)
}
  0x22   :  { %s237_s0 = smov 64   ;;  %s238_s9 = smov 4  }
  0x23   :  { %34 = dma.hbm_to_vmem [thread:$0]  %s308_s1, 256, %s29_s27, [#allocation6], %s237_s0, %s237_s0, %s238_s9  }
  0x24   :  { %227 = dma.done.wait [#allocation3], 256  }
  0x25   :  { %228 = vsyncadd [#allocation3], 4294967040 }
  0x26   :  { %229 = dma.done.wait [#allocation6], 256  }
  0x27   :  { %230 = vsyncadd [#allocation6], 4294967040  ;;  %v239_v0 = vmov 0.0   ;;  %vm240_vm0 = vmmov 0   ;;  %v159_v1 = vld [vmem:[#allocation5] sm:$0xff]   ;;  %v160_v2 = vld [vmem:[#allocation5 + $0x8] sm:$0xff]  }
  0x28   :  { %142 = vmatprep.subr.bf16.mxu0 %v239_v0  ;;  %146 = vmatprep.mubr.msk.bf16.mxu0 %vm240_vm0, %v239_v0  ;;  %v44_v3 = vld [vmem:[#allocation2] sm:$0xff]  ;;  %v45_v4 = vld [vmem:[#allocation2 + $0x8] sm:$0xff]  ;;  %vm70_vm1 = vcmask 261120   ;;  %s241_s13 = smov [#allocation7]  }
  0x29   :  { %143 = vmatpush3.bf16.msra.mxu0 %v159_v1  ;;  %v46_v5 = vpack.c.bf16 %v45_v4, %v44_v3  ;;  %v135_v6 = vld [vmem:[%s309_s2] ss:$0 sm:$0xff]  ;;  %s122_s14 = sshll.u32 %s241_s13, 4  ;;  %s123_s14 = int_to_ptr.vmem [resolvable:$true] %s122_s14 }
  0x2a   :  { %144 = vmatprep.subr.bf16.mxu0 %v239_v0  ;;  %s205_s15 = scalar_lea.vmem %s123_s14, 256  ;;  %p210_p3 = scmp.lt.s32.totalorder %s123_s14, %s123_s14 }
  0x2b   :  { %p206_p2 = scmp.ne.s32.totalorder %s123_s14, %s205_s15  ;;  %p211_p4 = scmp.lt.s32.totalorder %s205_s15, %s205_s15 }
  0x2d   :  { %145 = vmatpush3.bf16.msra.mxu0 %v160_v2  ;;  %p212_p5 = por %p211_p4, %p210_p3 }
  0x2f   :  { %p213_p6 = pnand %p212_p5, %p206_p2 }
  0x30   :  { %147 = vmatmul.mubr.msk.bf16.vlgmr.msra.gmra.mrb[0].mxu0 %vm70_vm1, %v46_v5 }
 0x103   :  { %v108_v7 = vpop.f32.mrb[0].mxu0 }
 0x104   :  { %v109_v8 = vadd.f32 %v135_v6, %v108_v7  ;;  %v148_v9 = vpop.f32.mrb[1].mxu0 }
 0x105   :  { %v111_v10 = vpop.f32.mrb[2].mxu0 }
 0x106   :  { %115 = vst [vmem:[#allocation7] sm:$0xff] %v109_v8  ;;  %v112_v11 = vadd.f32 %v135_v6, %v111_v10  ;;  %v149_v12 = vpop.f32.mrb[3].mxu0 }
 0x108   :  { %116 = vst [vmem:[#allocation7 + $0x8] sm:$0xff] %v112_v11 }
 0x109   :  { %216 = shalt.err (!%p213_p6)
}
 0x10a   :  { %s217_s17 = scalar_lea.hbm %s310_s3, 256 }
 0x10b   :  { %p218_p7 = scmp.ne.s32.totalorder %s310_s3, %s217_s17  ;;  %p221_p8 = scmp.lt.u32.totalorder %s217_s17, %s310_s3 }
 0x10d   :  { %p223_p9 = pnand %p221_p8, %p218_p7 }
 0x10f   :  { %226 = shalt.err (!%p223_p9)
}
 0x110   :  { %128 = dma.vmem_to_hbm [thread:$0]  %s123_s14, 256, %s310_s3, [#allocation4], %s234_s22, %s234_s22, %s235_s23  }
 0x111   :  { %231 = dma.done.wait [#allocation4], 256  }
 0x112   :  { %232 = vsyncadd [#allocation4], 4294967040 }
 0x113   :  { %132 = vsyncpa [#allocation3], 1 }
 0x114   :  { %133 = vsyncpa [#allocation6], 1 }
 0x115   :  { %134 = vsyncpa [#allocation4], 1 }

</bundles_post_ra>
